<compile_context>
chip_gen: v7x
topology: tpu7x:2x2x1
jax: 0.10.0
libtpu: 0.0.40
codegen_flags: <defaults>
</compile_context>

<pallas_src>
import jax
import jax.numpy as jnp
from jax.experimental import pallas as pl
from jax.experimental.pallas import tpu as pltpu

BN_EPS = 1e-5


def policy_head_kernel(sp_ref, x_ref, lp_ref, out_ref):
    """
    sp_ref : SMEM f32[2*C_in + 4] = [conv_w (2,C_in) row-major, gamma(2), beta(2)]
    x_ref  : VMEM f32[B, C_in, P]   input activations (P = H*W = 42)
    lp_ref : VMEM f32[2*P + 1, 7]   rows 0..2P-1 = Linear weight^T (channel-major
                                    rows, matching x.view(-1, 84)); row 2P = bias
    out_ref: VMEM f32[B, 7]
    """
    B, C, P = x_ref.shape
    n = B * P

    x = x_ref[...]                                   # [B, C, P] (a few vregs)
    xc = [x[:, c, :] for c in range(C)]              # per-channel [B, P]

    zs = []
    for o in range(2):
        # --- 1x1 conv on the VPU: y_o = sum_c wc[o, c] * x[:, c, :] ---
        acc = sp_ref[o * C] * xc[0]
        for c in range(1, C):
            acc = acc + sp_ref[o * C + c] * xc[c]            # [B, P] f32

        # --- BatchNorm2d, train-mode batch stats over (B, P); gamma folded ---
        mu = jnp.sum(acc, axis=(0, 1), keepdims=True) / n            # [1, 1]
        d = acc - mu
        var = jnp.sum(d * d, axis=(0, 1), keepdims=True) / n         # biased var
        scale = sp_ref[2 * C + o] * jax.lax.rsqrt(var + BN_EPS)      # gamma*rsqrt
        z = d * scale + sp_ref[2 * C + 2 + o]

        # --- ReLU ---
        zs.append(jnp.maximum(z, 0.0))                               # [B, P]

    # --- view(-1, 84): channel-major lane-contiguous slab, then one matmul ---
    zf = jnp.concatenate(zs, axis=1)                                 # [B, 2P]
    p2 = 2 * P
    out = jnp.dot(zf, lp_ref[0:p2, :], preferred_element_type=jnp.float32)
    out = out + lp_ref[p2:p2 + 1, :]                                 # + bias
    out_ref[...] = out.astype(out_ref.dtype)


def prepare_policy_head_params(conv_w, bn_gamma, bn_beta, lin_w, lin_b):
    """One-time weight packing (hoisted out of the per-call hot path)."""
    conv_w = jnp.asarray(conv_w, jnp.float32)                        # [2, C_in]
    sparams = jnp.concatenate([
        conv_w.reshape(-1),
        jnp.asarray(bn_gamma, jnp.float32).reshape(-1),
        jnp.asarray(bn_beta, jnp.float32).reshape(-1),
    ])                                                               # [2*C_in+4]
    # lin_w is [7, 84]; 84 = (channel, spatial) channel-major == x.view(-1, 84).
    w_t = jnp.asarray(lin_w, jnp.float32).T                          # [84, 7]
    lparams = jnp.concatenate(
        [w_t, jnp.asarray(lin_b, jnp.float32).reshape(1, 7)], axis=0)  # [85, 7]
    return sparams, lparams


def policy_head_forward(x_nchw, sparams, lparams):
    """x_nchw: [B, C_in, H, W] with 2*H*W == 84. Returns [B, 7] logits."""
    B, C, H, W = x_nchw.shape
    P = H * W
    assert 2 * P == 84 and lparams.shape[0] == 2 * P + 1
    x = x_nchw.reshape(B, C, P)       # contiguous reshape: metadata only

    # Grid-less single invocation: total footprint is a few KB, far below VMEM
    # limits on v5e/v6e/v7x — no tiling / vmem_limit tuning needed.
    # TODO(synk): on v7x with large B, add grid=(B//tb,) +
    #             dimension_semantics=("parallel",) to engage the 2nd TensorCore.
    return pl.pallas_call(
        policy_head_kernel,
        out_shape=jax.ShapeDtypeStruct((B, 7), jnp.float32),
        in_specs=[
            pl.BlockSpec(memory_space=pltpu.MemorySpace.SMEM),   # packed scalars
            pl.BlockSpec(memory_space=pltpu.MemorySpace.VMEM),   # x
            pl.BlockSpec(memory_space=pltpu.MemorySpace.VMEM),   # lin_w^T | bias
        ],
        out_specs=pl.BlockSpec(memory_space=pltpu.MemorySpace.VMEM),
    )(sparams, x, lparams)


def policy_head_reference(x, conv_w, bn_gamma, bn_beta, lin_w, lin_b):
    """Pure-JAX reference matching the PyTorch forward (train-mode BN)."""
    B = x.shape[0]
    y = jnp.einsum('oc,bchw->bohw', conv_w, x)
    mu = y.mean(axis=(0, 2, 3), keepdims=True)
    var = ((y - mu) ** 2).mean(axis=(0, 2, 3), keepdims=True)
    yn = (y - mu) / jnp.sqrt(var + BN_EPS)
    yn = yn * bn_gamma.reshape(1, 2, 1, 1) + bn_beta.reshape(1, 2, 1, 1)
    yr = jnp.maximum(yn, 0.0)
    return yr.reshape(B, 84) @ lin_w.T + lin_b


if __name__ == "__main__":
    key = jax.random.PRNGKey(0)
    k_x, k_cw, k_g, k_b, k_lw, k_lb = jax.random.split(key, 6)

    B, C_IN, H, W = 2, 4, 6, 7            # 2 * 6 * 7 = 84 -> Linear(84, 7)

    x = jax.random.normal(k_x, (B, C_IN, H, W), dtype=jnp.float32)
    conv_w = jax.random.normal(k_cw, (2, C_IN), dtype=jnp.float32) * 0.3
    bn_gamma = 1.0 + 0.1 * jax.random.normal(k_g, (2,), dtype=jnp.float32)
    bn_beta = 0.1 * jax.random.normal(k_b, (2,), dtype=jnp.float32)
    lin_w = jax.random.normal(k_lw, (7, 84), dtype=jnp.float32) * 0.1
    lin_b = jax.random.normal(k_lb, (7,), dtype=jnp.float32) * 0.1

    # One-time packing (weight-load time), then the hot forward call.
    sparams, lparams = prepare_policy_head_params(conv_w, bn_gamma, bn_beta,
                                                  lin_w, lin_b)
    out = policy_head_forward(x, sparams, lparams)
    out = jax.block_until_ready(out)

    ref = policy_head_reference(x, conv_w, bn_gamma, bn_beta, lin_w, lin_b)
    assert out.shape == (B, 7)
    assert jnp.allclose(out, ref, atol=1e-4, rtol=1e-4), (out, ref)

    # TODO(synk): BatchNorm running_mean/running_var updates (train-mode side
    # effect, not used by this forward's output) are not materialized.
    print("KERNEL_OK")
</pallas_src>

<mosaic_0001>
module attributes {stable_mosaic.version = 11 : i64} {
  func.func @policy_head_kernel(%arg0: memref<12xf32, #tpu.memory_space<smem>>, %arg1: memref<2x4x42xf32, #tpu.memory_space<vmem>>, %arg2: memref<85x7xf32, #tpu.memory_space<vmem>>, %arg3: memref<2x7xf32, #tpu.memory_space<vmem>>) attributes {dimension_semantics = [], scalar_prefetch = 0 : i64, scratch_operands = 0 : i64, tpu.core_type = #tpu.core_type<tc>} {
    %c0 = arith.constant 0 : index
    %c0_0 = arith.constant 0 : index
    %c0_1 = arith.constant 0 : index
    %0 = vector.load %arg1[%c0, %c0_0, %c0_1] : memref<2x4x42xf32, #tpu.memory_space<vmem>>, vector<2x4x42xf32>
    %1 = vector.extract_strided_slice %0 {offsets = [0, 0, 0], sizes = [2, 1, 42], strides = [1, 1, 1]} : vector<2x4x42xf32> to vector<2x1x42xf32>
    %2 = vector.shape_cast %1 : vector<2x1x42xf32> to vector<2x42xf32>
    %3 = vector.extract_strided_slice %0 {offsets = [0, 1, 0], sizes = [2, 1, 42], strides = [1, 1, 1]} : vector<2x4x42xf32> to vector<2x1x42xf32>
    %4 = vector.shape_cast %3 : vector<2x1x42xf32> to vector<2x42xf32>
    %5 = vector.extract_strided_slice %0 {offsets = [0, 2, 0], sizes = [2, 1, 42], strides = [1, 1, 1]} : vector<2x4x42xf32> to vector<2x1x42xf32>
    %6 = vector.shape_cast %5 : vector<2x1x42xf32> to vector<2x42xf32>
    %7 = vector.extract_strided_slice %0 {offsets = [0, 3, 0], sizes = [2, 1, 42], strides = [1, 1, 1]} : vector<2x4x42xf32> to vector<2x1x42xf32>
    %8 = vector.shape_cast %7 : vector<2x1x42xf32> to vector<2x42xf32>
    %c0_2 = arith.constant 0 : index
    %9 = memref.load %arg0[%c0_2] : memref<12xf32, #tpu.memory_space<smem>>
    %10 = vector.broadcast %9 : f32 to vector<2x42xf32>
    %11 = arith.mulf %10, %2 : vector<2x42xf32>
    %c1 = arith.constant 1 : index
    %12 = memref.load %arg0[%c1] : memref<12xf32, #tpu.memory_space<smem>>
    %13 = vector.broadcast %12 : f32 to vector<2x42xf32>
    %14 = arith.mulf %13, %4 : vector<2x42xf32>
    %15 = arith.addf %11, %14 : vector<2x42xf32>
    %c2 = arith.constant 2 : index
    %16 = memref.load %arg0[%c2] : memref<12xf32, #tpu.memory_space<smem>>
    %17 = vector.broadcast %16 : f32 to vector<2x42xf32>
    %18 = arith.mulf %17, %6 : vector<2x42xf32>
    %19 = arith.addf %15, %18 : vector<2x42xf32>
    %c3 = arith.constant 3 : index
    %20 = memref.load %arg0[%c3] : memref<12xf32, #tpu.memory_space<smem>>
    %21 = vector.broadcast %20 : f32 to vector<2x42xf32>
    %22 = arith.mulf %21, %8 : vector<2x42xf32>
    %23 = arith.addf %19, %22 : vector<2x42xf32>
    %24 = vector.shape_cast %23 : vector<2x42xf32> to vector<1x2x42xf32>
    %cst = arith.constant dense<0.000000e+00> : vector<1xf32>
    %25 = vector.multi_reduction <add>, %24, %cst [1, 2] : vector<1x2x42xf32> to vector<1xf32>
    %26 = vector.shape_cast %25 : vector<1xf32> to vector<1x1x1xf32>
    %27 = vector.extract %26[0, 0, 0] : f32 from vector<1x1x1xf32>
    %28 = vector.broadcast %27 : f32 to vector<1x1xf32>
    %cst_3 = arith.constant 8.400000e+01 : f32
    %29 = vector.broadcast %cst_3 : f32 to vector<1x1xf32>
    %30 = arith.divf %28, %29 : vector<1x1xf32>
    %31 = vector.broadcast %30 : vector<1x1xf32> to vector<2x42xf32>
    %32 = arith.subf %23, %31 : vector<2x42xf32>
    %33 = arith.mulf %32, %32 : vector<2x42xf32>
    %34 = vector.shape_cast %33 : vector<2x42xf32> to vector<1x2x42xf32>
    %cst_4 = arith.constant dense<0.000000e+00> : vector<1xf32>
    %35 = vector.multi_reduction <add>, %34, %cst_4 [1, 2] : vector<1x2x42xf32> to vector<1xf32>
    %36 = vector.shape_cast %35 : vector<1xf32> to vector<1x1x1xf32>
    %37 = vector.extract %36[0, 0, 0] : f32 from vector<1x1x1xf32>
    %38 = vector.broadcast %37 : f32 to vector<1x1xf32>
    %cst_5 = arith.constant 8.400000e+01 : f32
    %39 = vector.broadcast %cst_5 : f32 to vector<1x1xf32>
    %40 = arith.divf %38, %39 : vector<1x1xf32>
    %c8 = arith.constant 8 : index
    %41 = memref.load %arg0[%c8] : memref<12xf32, #tpu.memory_space<smem>>
    %cst_6 = arith.constant 9.99999974E-6 : f32
    %42 = vector.broadcast %cst_6 : f32 to vector<1x1xf32>
    %43 = arith.addf %40, %42 : vector<1x1xf32>
    %44 = math.rsqrt %43 : vector<1x1xf32>
    %45 = vector.broadcast %41 : f32 to vector<1x1xf32>
    %46 = arith.mulf %45, %44 : vector<1x1xf32>
    %47 = vector.broadcast %46 : vector<1x1xf32> to vector<2x42xf32>
    %48 = arith.mulf %32, %47 : vector<2x42xf32>
    %c10 = arith.constant 10 : index
    %49 = memref.load %arg0[%c10] : memref<12xf32, #tpu.memory_space<smem>>
    %50 = vector.broadcast %49 : f32 to vector<2x42xf32>
    %51 = arith.addf %48, %50 : vector<2x42xf32>
    %cst_7 = arith.constant 0.000000e+00 : f32
    %52 = vector.broadcast %cst_7 : f32 to vector<2x42xf32>
    %53 = arith.maximumf %51, %52 : vector<2x42xf32>
    %c4 = arith.constant 4 : index
    %54 = memref.load %arg0[%c4] : memref<12xf32, #tpu.memory_space<smem>>
    %55 = vector.broadcast %54 : f32 to vector<2x42xf32>
    %56 = arith.mulf %55, %2 : vector<2x42xf32>
    %c5 = arith.constant 5 : index
    %57 = memref.load %arg0[%c5] : memref<12xf32, #tpu.memory_space<smem>>
    %58 = vector.broadcast %57 : f32 to vector<2x42xf32>
    %59 = arith.mulf %58, %4 : vector<2x42xf32>
    %60 = arith.addf %56, %59 : vector<2x42xf32>
    %c6 = arith.constant 6 : index
    %61 = memref.load %arg0[%c6] : memref<12xf32, #tpu.memory_space<smem>>
    %62 = vector.broadcast %61 : f32 to vector<2x42xf32>
    %63 = arith.mulf %62, %6 : vector<2x42xf32>
    %64 = arith.addf %60, %63 : vector<2x42xf32>
    %c7 = arith.constant 7 : index
    %65 = memref.load %arg0[%c7] : memref<12xf32, #tpu.memory_space<smem>>
    %66 = vector.broadcast %65 : f32 to vector<2x42xf32>
    %67 = arith.mulf %66, %8 : vector<2x42xf32>
    %68 = arith.addf %64, %67 : vector<2x42xf32>
    %69 = vector.shape_cast %68 : vector<2x42xf32> to vector<1x2x42xf32>
    %cst_8 = arith.constant dense<0.000000e+00> : vector<1xf32>
    %70 = vector.multi_reduction <add>, %69, %cst_8 [1, 2] : vector<1x2x42xf32> to vector<1xf32>
    %71 = vector.shape_cast %70 : vector<1xf32> to vector<1x1x1xf32>
    %72 = vector.extract %71[0, 0, 0] : f32 from vector<1x1x1xf32>
    %73 = vector.broadcast %72 : f32 to vector<1x1xf32>
    %cst_9 = arith.constant 8.400000e+01 : f32
    %74 = vector.broadcast %cst_9 : f32 to vector<1x1xf32>
    %75 = arith.divf %73, %74 : vector<1x1xf32>
    %76 = vector.broadcast %75 : vector<1x1xf32> to vector<2x42xf32>
    %77 = arith.subf %68, %76 : vector<2x42xf32>
    %78 = arith.mulf %77, %77 : vector<2x42xf32>
    %79 = vector.shape_cast %78 : vector<2x42xf32> to vector<1x2x42xf32>
    %cst_10 = arith.constant dense<0.000000e+00> : vector<1xf32>
    %80 = vector.multi_reduction <add>, %79, %cst_10 [1, 2] : vector<1x2x42xf32> to vector<1xf32>
    %81 = vector.shape_cast %80 : vector<1xf32> to vector<1x1x1xf32>
    %82 = vector.extract %81[0, 0, 0] : f32 from vector<1x1x1xf32>
    %83 = vector.broadcast %82 : f32 to vector<1x1xf32>
    %cst_11 = arith.constant 8.400000e+01 : f32
    %84 = vector.broadcast %cst_11 : f32 to vector<1x1xf32>
    %85 = arith.divf %83, %84 : vector<1x1xf32>
    %c9 = arith.constant 9 : index
    %86 = memref.load %arg0[%c9] : memref<12xf32, #tpu.memory_space<smem>>
    %cst_12 = arith.constant 9.99999974E-6 : f32
    %87 = vector.broadcast %cst_12 : f32 to vector<1x1xf32>
    %88 = arith.addf %85, %87 : vector<1x1xf32>
    %89 = math.rsqrt %88 : vector<1x1xf32>
    %90 = vector.broadcast %86 : f32 to vector<1x1xf32>
    %91 = arith.mulf %90, %89 : vector<1x1xf32>
    %92 = vector.broadcast %91 : vector<1x1xf32> to vector<2x42xf32>
    %93 = arith.mulf %77, %92 : vector<2x42xf32>
    %c11 = arith.constant 11 : index
    %94 = memref.load %arg0[%c11] : memref<12xf32, #tpu.memory_space<smem>>
    %95 = vector.broadcast %94 : f32 to vector<2x42xf32>
    %96 = arith.addf %93, %95 : vector<2x42xf32>
    %cst_13 = arith.constant 0.000000e+00 : f32
    %97 = vector.broadcast %cst_13 : f32 to vector<2x42xf32>
    %98 = arith.maximumf %96, %97 : vector<2x42xf32>
    %99 = tpu.concatenate %53, %98 in 1 : vector<2x42xf32>, vector<2x42xf32> -> vector<2x84xf32>
    %c0_14 = arith.constant 0 : index
    %c0_15 = arith.constant 0 : index
    %100 = vector.load %arg2[%c0_14, %c0_15] : memref<85x7xf32, #tpu.memory_space<vmem>>, vector<84x7xf32>
    %cst_16 = arith.constant dense<0.000000e+00> : vector<2x7xf32>
    %101 = tpu.matmul %99, %100, %cst_16 {dimension_numbers = #tpu.dot_dimension_numbers<[1], [0], [0], [1], [0, 0, 1, 1], [], []>} : vector<2x84xf32>, vector<84x7xf32>, vector<2x7xf32> -> vector<2x7xf32>
    %c84 = arith.constant 84 : index
    %c0_17 = arith.constant 0 : index
    %102 = vector.load %arg2[%c84, %c0_17] : memref<85x7xf32, #tpu.memory_space<vmem>>, vector<1x7xf32>
    %103 = vector.broadcast %102 : vector<1x7xf32> to vector<2x7xf32>
    %104 = arith.addf %101, %103 : vector<2x7xf32>
    %c0_18 = arith.constant 0 : index
    %c0_19 = arith.constant 0 : index
    %105 = vector.load %arg3[%c0_18, %c0_19] : memref<2x7xf32, #tpu.memory_space<vmem>>, vector<2x7xf32>
    tpu.vector_store %arg3[%c0_18, %c0_19], %104 {strides = array<i32>} : memref<2x7xf32, #tpu.memory_space<vmem>>, vector<2x7xf32>,
    return
  }
}

</mosaic_0001>

<bundles_post_ra>
// kernel: tpu_custom_call.1
= control target key start
LH: loop header
LB: loop body
LE: loop exit
PB: predicated region body
PF: predicated region fallthrough
CT: control target
= control target key end

     0   :  { %8 = vsyncpa [#allocation4], 0  ;;  %s568_s0 = inlined_call_operand.vmem [shape: f32[12], index: 0, kind: input, shape index: {}]   ;;  %s569_s1 = inlined_call_operand.vmem [shape: f32[2,4,42], index: 1, kind: input, shape index: {}]   ;;  %s570_s2 = inlined_call_operand.vmem [shape: f32[85,7], index: 2, kind: input, shape index: {}]   ;;  %s571_s3 = inlined_call_operand.hbm [shape: f32[2,7], index: 3, kind: output, shape index: {}]  }
   0x1   :  { %9 = vsyncpa [#allocation3], 0  ;;  %s16_s14 = sshll.u32 %s568_s0, 4  ;;  %s17_s14 = int_to_ptr.vmem [resolvable:$true] %s16_s14 }
   0x2   :  { %s424_s15 = scalar_lea.vmem %s17_s14, 16  ;;  %p429_p1 = scmp.lt.s32.totalorder %s17_s14, %s17_s14 }
   0x3   :  { %p425_p0 = scmp.ne.s32.totalorder %s17_s14, %s424_s15  ;;  %p430_p2 = scmp.lt.s32.totalorder %s424_s15, %s424_s15 }
   0x5   :  { %p431_p3 = por %p430_p2, %p429_p1 }
   0x7   :  { %p432_p4 = pnand %p431_p3, %p425_p0 }
   0x9   :  { %435 = shalt.err (!%p432_p4)
}
   0xa   :  { %s462_s16 = smov [#allocation2]  }
   0xb   :  { %19 = dma.vmem_to_smem %s17_s14, 16, %s462_s16, [#allocation4]  }
   0xc   :  { %458 = dma.done.wait [#allocation4], 16  }
   0xd   :  { %459 = vsyncadd [#allocation4], 4294967280 }
   0xe   :  { %27 = sfence }
   0xf   :  { %s30_s17 = sld [smem:[#allocation2]]  ;;  %s340_s18 = sld [smem:[#allocation2 + $0x1]]  ;;  %v28_v0 = vld [vmem:[%s569_s1] sm:$0xf]  ;;  %v29_v1 = vld [vmem:[%s569_s1 + $0x4] sm:$0xf] }
  0x10   :  { %s341_s19 = sld [smem:[#allocation2 + $0x2]]  ;;  %s342_s20 = sld [smem:[#allocation2 + $0x3]]  ;;  %vm73_vm0 = vcmask 1041409   ;;  %vm76_vm1 = vcmask 336896   ;;  %vm249_vm2 = vcmask 1043456   ;;  %vm465_vm3 = vmmov 0  }
  0x11   :  { %s346_s1 = sld [smem:[#allocation2 + $0x5]]  ;;  %s345_s24 = sld [smem:[#allocation2 + $0x4]]  ;;  %vm227_vm4 = vcmask 343040   ;;  %vm245_vm5 = vcmask 687104   ;;  %vm323_vm6 = vcmask 50176  }
  0x12   :  { %s347_s25 = sld [smem:[#allocation2 + $0x6]]  ;;  %s348_s26 = sld [smem:[#allocation2 + $0x7]] }
  0x13   :  { %s349_s23 = sld [smem:[#allocation2 + $0x9]]  ;;  %s467_s4 = smov [#allocation5]  }
  0x14   :  { %s331_s5 = sshll.u32 %s467_s4, 4  ;;  %s332_s5 = int_to_ptr.vmem [resolvable:$true] %s331_s5 }
  0x15   :  { %v31_v2 = vstv %s30_s17  ;;  %v35_v5 = vstv %s340_s18  ;;  %s436_s6 = scalar_lea.vmem %s332_s5, 32  ;;  %p441_p6 = scmp.lt.s32.totalorder %s332_s5, %s332_s5 }
  0x16   :  { %v32_v3 = vmul.f32 %v31_v2, %v28_v0  ;;  %v33_v4 = vmul.f32 %v31_v2, %v29_v1  ;;  %v47_v6 = vstv %s341_s19  ;;  %v36_v7 = vmul.f32 %v35_v5, %v28_v0  ;;  %p437_p5 = scmp.ne.s32.totalorder %s332_s5, %s436_s6  ;;  %p442_p7 = scmp.lt.s32.totalorder %s436_s6, %s436_s6 }
  0x17   :  { %v37_v8 = vmul.f32 %v35_v5, %v29_v1  ;;  %v48_v9 = vmul.f32 %v47_v6, %v28_v0  ;;  %v49_v10 = vmul.f32 %v47_v6, %v29_v1  ;;  %v59_v11 = vstv %s342_s20 }
  0x18   :  { %v40_v12 = vrot.slane %v36_v7, 1  ;;  %v60_v16 = vmul.f32 %v59_v11, %v28_v0  ;;  %v61_v17 = vmul.f32 %v59_v11, %v29_v1  ;;  %v129_v29 = vstv %s346_s1  ;;  %s350_s1 = sld [smem:[#allocation2 + $0xb]]  ;;  %p443_p8 = por %p442_p7, %p441_p6 }
  0x19   :  { %v41_v13 = vrot.slane %v37_v8, 1  ;;  %v52_v14 = vrot.slane %v48_v9, 2  ;;  %v53_v15 = vrot.slane %v49_v10, 2  ;;  %v131_v30 = vmul.f32 %v129_v29, %v29_v1 }
  0x1a   :  { %v44_v18 = vadd.f32 %v40_v12, %v32_v3  ;;  %v64_v20 = vrot.slane %v60_v16, 3  ;;  %v65_v21 = vrot.slane %v61_v17, 3  ;;  %v125_v31 = vstv %s345_s24  ;;  %p444_p9 = pnand %p443_p8, %p437_p5 }
  0x1b   :  { %v45_v19 = vadd.f32 %v41_v13, %v33_v4  ;;  %v141_v32 = vstv %s347_s25  ;;  %v127_v33 = vmul.f32 %v125_v31, %v29_v1  ;;  %v130_v34 = vmul.f32 %v129_v29, %v28_v0 }
  0x1c   :  { %v56_v22 = vadd.f32 %v52_v14, %v44_v18  ;;  %v135_v35 = vrot.slane %v131_v30, 1  ;;  %v143_v36 = vmul.f32 %v141_v32, %v29_v1  ;;  %v153_v37 = vstv %s348_s26  ;;  %s466_s26 = smov 42  }
  0x1d   :  { %v57_v23 = vadd.f32 %v53_v15, %v45_v19  ;;  %v126_v38 = vmul.f32 %v125_v31, %v28_v0  ;;  %v134_v39 = vrot.slane %v130_v34, 1  ;;  %v142_v41 = vmul.f32 %v141_v32, %v28_v0  ;;  %v229_v31 = vld [vmem:[%s570_s2] sm:$0xff]  ;;  %v230_v32 = vld [vmem:[%s570_s2 + $0x8] sm:$0xff] }
  0x1e   :  { %v68_v24 = vadd.f32 %v64_v20, %v56_v22  ;;  %v139_v40 = vadd.f32 %v135_v35, %v127_v33  ;;  %v147_v42 = vrot.slane %v143_v36, 2  ;;  %v155_v43 = vmul.f32 %v153_v37, %v29_v1  ;;  %v231_v33 = vld [vmem:[%s570_s2 + $0x10] sm:$0xff]  ;;  %v232_v36 = vld [vmem:[%s570_s2 + $0x18] sm:$0xff] }
  0x1f   :  { %v69_v25 = vadd.f32 %v65_v21, %v57_v23  ;;  %v138_v44 = vadd.f32 %v134_v39, %v126_v38  ;;  %v146_v45 = vrot.slane %v142_v41, 2  ;;  %v154_v46 = vmul.f32 %v153_v37, %v28_v0  ;;  %v233_v38 = vld [vmem:[%s570_s2 + $0x20] sm:$0xff]  ;;  %v234_v39 = vld [vmem:[%s570_s2 + $0x28] sm:$0xff]  ;;  %v235_v41 = vld [vmem:[%s570_s2 + $0x30] sm:$0xff] }
  0x20   :  { %v151_v47 = vadd.f32 %v147_v42, %v139_v40  ;;  %v159_v48 = vrot.slane %v155_v43, 3  ;;  %v463_v34 = vmov 0.0|0.0   ;;  %v392_v35 = vpack.c.bf16 %v230_v32, %v229_v31  ;;  %v236_v42 = vld [vmem:[%s570_s2 + $0x38] sm:$0xff] }
  0x21   :  { %v72_v26 = vrot.slane %v69_v25, 7  ;;  %v150_v49 = vadd.f32 %v146_v45, %v138_v44  ;;  %v158_v50 = vrot.slane %v154_v46, 3  ;;  %391 = vmatprep.subr.bf16.mxu0 %v463_v34  ;;  %v395_v37 = vpack.c.bf16 %v232_v36, %v231_v33  ;;  %v237_v44 = vld [vmem:[%s570_s2 + $0x40] sm:$0xff]  ;;  %v238_v45 = vld [vmem:[%s570_s2 + $0x48] sm:$0xff] }
  0x22   :  { %v163_v51 = vadd.f32 %v159_v48, %v151_v47  ;;  %393 = vmatpush3.bf16.msra.mxu0 %v392_v35  ;;  %v398_v40 = vpack.c.bf16 %v234_v39, %v233_v38  ;;  %v401_v43 = vpack.c.bf16 %v236_v42, %v235_v41  ;;  %v404_v46 = vpack.c.bf16 %v238_v45, %v237_v44 }
  0x23   :  { %v74_v27 = vsel %vm73_vm0, %v72_v26, %v68_v24  ;;  %v162_v52 = vadd.f32 %v158_v50, %v150_v49  ;;  %394 = vmatprep.subr.bf16.mxu0 %v463_v34  ;;  %v464_v47 = vmov 0.0  }
  0x24   :  { %v77_v28 = vsel %vm76_vm1, %v74_v27, 0.0  ;;  %v166_v53 = vrot.slane %v163_v51, 7  ;;  %388 = vmatprep.mubr.msk.f32.mxu0 %vm465_vm3, %v464_v47 }
  0x25   :  { %78 = vadd.xlane.f32.xlu0 %v77_v28 }
  0x26   :  { %v167_v54 = vsel %vm73_vm0, %v166_v53, %v162_v52  ;;  %396 = vmatpush3.bf16.msra.mxu0 %v395_v37 }
  0x27   :  { %v169_v55 = vsel %vm76_vm1, %v167_v54, 0.0  ;;  %397 = vmatprep.subr.bf16.mxu0 %v463_v34 }
  0x28   :  { %170 = vadd.xlane.f32.xlu1 %v169_v55 }
  0x2a   :  { %399 = vmatpush3.bf16.msra.mxu0 %v398_v40 }
  0x2b   :  { %400 = vmatprep.subr.bf16.mxu0 %v463_v34 }
  0x2e   :  { %402 = vmatpush3.bf16.msra.mxu0 %v401_v43 }
  0x2f   :  { %403 = vmatprep.subr.bf16.mxu0 %v463_v34 }
  0x32   :  { %405 = vmatpush3.bf16.msra.mxu0 %v404_v46 }
  0x33   :  { %386 = vmatprep.subr.mxu0 %v464_v47 }
  0xb2   :  { %v79_v56 = vpop.xlane.xlu0 %78 }
  0xb3   :  { %v80_v57 = vrot.slane %v79_v56, 4 }
  0xb5   :  { %v81_v58 = vadd.f32 %v80_v57, %v79_v56  ;;  %v171_v8 = vpop.xlane.xlu1 %170 }
  0xb6   :  { %v172_v9 = vrot.slane %v171_v8, 4 }
  0xb7   :  { %v82_v59 = vrot.slane %v81_v58, 2 }
  0xb8   :  { %v173_v10 = vadd.f32 %v172_v9, %v171_v8 }
  0xb9   :  { %v83_v60 = vadd.f32 %v82_v59, %v81_v58  ;;  %v205_v58 = vstv %s349_s23  ;;  %v239_v59 = vld [vmem:[%s570_s2 + $0x50] sm:$0xf] }
  0xba   :  { %v174_v11 = vrot.slane %v173_v10, 2  ;;  %387 = vmatpush3.msk.msra.mxu0 %vm249_vm2, %v239_v59 }
  0xbb   :  { %v84_v61 = vrot.slane %v83_v60, 1 }
  0xbc   :  { %v175_v15 = vadd.f32 %v174_v11, %v173_v10 }
  0xbd   :  { %v85_v62 = vadd.f32 %v84_v61, %v83_v60 }
  0xbe   :  { %v176_v18 = vrot.slane %v175_v15, 1 }
  0xbf   :  { %406 = vpush %v85_v62  ;;  %v210_v62 = vstv %s350_s1 }
  0xc0   :  { %v177_v21 = vadd.f32 %v176_v18, %v175_v15 }
  0xf0   :  { %s407_s27 = spop %406 }
  0xf1   :  { %v87_v63 = vstv %s407_s27  ;;  %s343_s27 = sld [smem:[#allocation2 + $0x8]] }
  0xf2   :  { %v89_v0 = vmul.f32 0.011904762, %v87_v63 }
  0xf4   :  { %v501_v1 = vsub.f32 %v68_v24, %v89_v0  ;;  %v503_v2 = vsub.f32 %v69_v25, %v89_v0 }
  0xf6   :  { %v93_v3 = vmul.f32 %v503_v2, %v503_v2  ;;  %v92_v4 = vmul.f32 %v501_v1, %v501_v1 }
  0xf8   :  { %v96_v5 = vrot.slane %v93_v3, 7 }
  0xfa   :  { %v97_v6 = vsel %vm73_vm0, %v96_v5, %v92_v4 }
  0xfb   :  { %v99_v7 = vsel %vm76_vm1, %v97_v6, 0.0 }
  0xfc   :  { %100 = vadd.xlane.f32.xlu0 %v99_v7 }
 0x189   :  { %v101_v12 = vpop.xlane.xlu0 %100 }
 0x18a   :  { %v102_v13 = vrot.slane %v101_v12, 4 }
 0x18c   :  { %v103_v14 = vadd.f32 %v102_v13, %v101_v12  ;;  %v114_v13 = vstv %s343_s27 }
 0x18e   :  { %v104_v16 = vrot.slane %v103_v14, 2 }
 0x190   :  { %v105_v17 = vadd.f32 %v104_v16, %v103_v14 }
 0x192   :  { %v106_v19 = vrot.slane %v105_v17, 1 }
 0x194   :  { %v107_v20 = vadd.f32 %v106_v19, %v105_v17 }
 0x196   :  { %408 = vpush %v107_v20 }
 0x197   :  { %410 = vpush %v177_v21 }
 0x1c7   :  { %s511_s28 = spop %408 }
 0x1c8   :  { %s411_s29 = spop %410  ;;  %v109_v9 = vstv %s511_s28 }
 0x1c9   :  { %v179_v22 = vstv %s411_s29  ;;  %v110_v10 = vmul.f32 0.011904762, %v109_v9  ;;  %s344_s29 = sld [smem:[#allocation2 + $0xa]] }
 0x1ca   :  { %v180_v23 = vmul.f32 0.011904762, %v179_v22 }
 0x1cb   :  { %v112_v11 = vadd.f32 1e-05, %v110_v10 }
 0x1cc   :  { %v181_v24 = vsub.f32 %v162_v52, %v180_v23  ;;  %v182_v25 = vsub.f32 %v163_v51, %v180_v23 }
 0x1ce   :  { %v184_v26 = vmul.f32 %v182_v25, %v182_v25  ;;  %v183_v27 = vmul.f32 %v181_v24, %v181_v24 }
 0x1cf   :  { %v119_v16 = vstv %s344_s29 }
 0x1d0   :  { %v187_v28 = vrot.slane %v184_v26, 7  ;;  %v351_v26 = vld [vmem:[%s570_s2 + $0x54] ss:$0 sm:$0xff] }
 0x1d2   :  { %v188_v29 = vsel %vm73_vm0, %v187_v28, %v183_v27 }
 0x1d3   :  { %v190_v30 = vsel %vm76_vm1, %v188_v29, 0.0 }
 0x1d4   :  { %191 = vadd.xlane.f32.xlu1 %v190_v30 }
 0x261   :  { %v192_v48 = vpop.xlane.xlu1 %191 }
 0x262   :  { %v193_v49 = vrot.slane %v192_v48, 4 }
 0x264   :  { %v194_v50 = vadd.f32 %v193_v49, %v192_v48 }
 0x266   :  { %v195_v51 = vrot.slane %v194_v50, 2 }
 0x268   :  { %v196_v52 = vadd.f32 %v195_v51, %v194_v50 }
 0x26a   :  { %v197_v53 = vrot.slane %v196_v52, 1 }
 0x26c   :  { %v198_v54 = vadd.f32 %v197_v53, %v196_v52 }
 0x26e   :  { %412 = vpush %v198_v54 }
 0x29f   :  { %s413_s0 = spop %412 }
 0x2a0   :  { %v200_v55 = vstv %s413_s0 }
 0x2a1   :  { %v201_v56 = vmul.f32 0.011904762, %v200_v55 }
 0x2a3   :  { %v203_v57 = vadd.f32 1e-05, %v201_v56 }
 0x2a5   :  { %420 = vrsqrt.f32 %v203_v57 }
 0x2a6   :  { %422 = vrsqrt.f32 %v112_v11 }
 0x2af   :  { %v421_v60 = vpop.eup %420 }
 0x2b0   :  { %v206_v61 = vmul.f32 %v421_v60, %v205_v58  ;;  %v423_v12 = vpop.eup %422 }
 0x2b1   :  { %v115_v14 = vmul.f32 %v423_v12, %v114_v13 }
 0x2b2   :  { %v207_v63 = vmul.f32 %v206_v61, %v181_v24  ;;  %v208_v0 = vmul.f32 %v206_v61, %v182_v25 }
 0x2b3   :  { %v117_v15 = vmul.f32 %v115_v14, %v503_v2  ;;  %v116_v18 = vmul.f32 %v115_v14, %v501_v1 }
 0x2b4   :  { %v211_v3 = vadd.f32 %v210_v62, %v207_v63  ;;  %v212_v4 = vadd.f32 %v210_v62, %v208_v0 }
 0x2b5   :  { %v121_v17 = vadd.f32 %v119_v16, %v117_v15  ;;  %v120_v20 = vadd.f32 %v119_v16, %v116_v18 }
 0x2b6   :  { %v214_v5 = vmax.f32 %v212_v4, 0.0  ;;  %v213_v6 = vmax.f32 %v211_v3, 0.0 }
 0x2b7   :  { %v123_v19 = vmax.f32 %v121_v17, 0.0  ;;  %v122_v22 = vmax.f32 %v120_v20, 0.0 }
 0x2b8   :  { %v222_v7 = vrot.slane %v214_v5, 7 }
 0x2b9   :  { %v217_v21 = vrot.slane %v123_v19, 7 }
 0x2ba   :  { %v223_v8 = vsel %vm73_vm0, %v222_v7, %v213_v6 }
 0x2bb   :  { %224 = vrot.lane.b32.xlu0 %v223_v8, %s466_s26  ;;  %v218_v24 = vsel %vm73_vm0, %v217_v21, %v122_v22 }
 0x32d   :  { %v225_v23 = vpop.permute.xlu0 %224 }
 0x32e   :  { %v228_v25 = vsel %vm227_vm4, %v218_v24, %v225_v23 }
 0x32f   :  { %389 = vmatmul.mubr.msk.f32.vlgmr.msra.gmra.mrb[0].mxu0 %vm245_vm5, %v228_v25 }
 0x402   :  { %v319_v2 = vpop.f32.mrb[0].mxu0 }
 0x403   :  { %v320_v1 = vadd.f32 %v351_v26, %v319_v2  ;;  %v390_v27 = vpop.f32.mrb[1].mxu0 }
 0x405   :  { %324 = vst.msk [vmem:[#allocation5] sm:$0x3] %vm323_vm6, %v320_v1 }
 0x406   :  { %447 = shalt.err (!%p444_p9)
}
 0x407   :  { %s448_s9 = scalar_lea.hbm %s571_s3, 32 }
 0x408   :  { %p449_p10 = scmp.ne.s32.totalorder %s571_s3, %s448_s9  ;;  %p452_p11 = scmp.lt.u32.totalorder %s448_s9, %s571_s3 }
 0x40a   :  { %p454_p12 = pnand %p452_p11, %p449_p10 }
 0x40c   :  { %457 = shalt.err (!%p454_p12)
}
 0x40d   :  { %334 = dma.vmem_to_hbm [thread:$0]  %s332_s5, 32, %s571_s3, [#allocation3]  }
 0x40e   :  { %460 = dma.done.wait [#allocation3], 32  }
 0x40f   :  { %461 = vsyncadd [#allocation3], 4294967264 }
 0x410   :  { %338 = vsyncpa [#allocation3], 1 }
 0x411   :  { %339 = vsyncpa [#allocation4], 1 }

</bundles_post_ra>
